<compile_context>
chip_gen: v7x
topology: tpu7x:2x2x1
jax: 0.10.0
libtpu: 0.0.40
codegen_flags: <defaults>
</compile_context>

<pallas_src>
import functools

import jax
import jax.numpy as jnp
from jax import lax
from jax.experimental import pallas as pl
from jax.experimental.pallas import tpu as pltpu


def _round_up(x, m):
    return ((x + m - 1) // m) * m


def _conv_bn_silu_kernel(x_ref, xh_ref, w_ref, b_ref, o_ref, *,
                         kh, kw, wp, tl, halo):
    # x_ref : (1, C, TL)        bf16  current tile of the padded-flat input
    # xh_ref: (1, C, TLH)       bf16  head of the next tile (halo columns)
    # w_ref : (kh*kw*O, C)      bf16  per-tap weights, BN scale folded in
    # b_ref : (O, 1)            f32   folded BN bias
    # o_ref : (1, O, TL)        f32   output tile (padded-flat, NCHW-major)
    out_ch = o_ref.shape[1]
    xwin = jnp.concatenate([x_ref[0], xh_ref[0]], axis=1)[:, :tl + halo]
    # One MXU dot covering all taps; accumulate in f32.
    p = jnp.dot(w_ref[...], xwin, preferred_element_type=jnp.float32)
    acc = jnp.zeros((out_ch, tl), jnp.float32)
    for ki in range(kh):
        for kj in range(kw):
            tap = ki * kw + kj
            shift = ki * wp + kj          # flat shift of this tap in padded coords
            acc = acc + p[tap * out_ch:(tap + 1) * out_ch, shift:shift + tl]
    y = acc + b_ref[...]                                   # BN bias (scale folded)
    sig = pl.reciprocal(1.0 + jnp.exp(-y), approx=True)    # sigmoid on EUP slots
    o_ref[0] = (y * sig).astype(o_ref.dtype)               # SiLU


@functools.partial(jax.jit, static_argnames=("stride", "eps", "tl"))
def base_conv_forward(x_nchw, weight_oihw, gamma, beta, running_mean,
                      running_var, *, stride=1, eps=1e-5, tl=512):
    N, C, H, W = x_nchw.shape
    O, Cw, kh, kw = weight_oihw.shape
    assert C == Cw, "groups=1 only"
    ph, pw = (kh - 1) // 2, (kw - 1) // 2
    Hp, Wp = H + 2 * ph, W + 2 * pw
    H1, W1 = Hp - kh + 1, Wp - kw + 1          # stride-1 output spatial dims

    # Fold eval-mode BatchNorm: scale into weights, bias kept separate.
    # TODO(synk): training-mode BN (batch statistics) not implemented; eval-mode used.
    scale = gamma.astype(jnp.float32) / jnp.sqrt(
        running_var.astype(jnp.float32) + eps)
    bias = (beta.astype(jnp.float32)
            - running_mean.astype(jnp.float32) * scale).reshape(O, 1)

    # Weights -> (kh*kw*O, C), tap-major (ki, kj), bf16, BN scale folded in.
    wmat = weight_oihw.astype(jnp.float32) * scale[:, None, None, None]
    wmat = jnp.transpose(wmat, (2, 3, 0, 1)).reshape(kh * kw * O, C)
    wmat = wmat.astype(jnp.bfloat16)

    # Input: spatial zero-pad, keep channel-major, flatten padded spatial, bf16.
    xp = jnp.pad(x_nchw.astype(jnp.bfloat16),
                 ((0, 0), (0, 0), (ph, ph), (pw, pw)))
    F = Hp * Wp
    halo = (kh - 1) * Wp + (kw - 1)            # largest flat shift of any tap
    TLH = _round_up(max(halo, 1), 128)         # halo block width (lane multiple)
    TL = _round_up(max(tl, TLH), TLH)          # main tile width; TL % TLH == 0
    T = pl.cdiv(F, TL)                         # output tiles per image
    xflat = xp.reshape(N, C, F)
    xflat = jnp.pad(xflat, ((0, 0), (0, 0), (0, T * TL + TLH - F)))

    blocks_per_tile = TL // TLH
    kernel = functools.partial(_conv_bn_silu_kernel, kh=kh, kw=kw, wp=Wp,
                               tl=TL, halo=halo)

    out = pl.pallas_call(
        kernel,
        out_shape=jax.ShapeDtypeStruct((N, O, T * TL), jnp.float32),
        grid_spec=pl.GridSpec(
            grid=(N, T),
            in_specs=[
                pl.BlockSpec((1, C, TL), lambda n, t: (n, 0, t)),
                pl.BlockSpec((1, C, TLH),
                             lambda n, t: (n, 0, (t + 1) * blocks_per_tile)),
                pl.BlockSpec((kh * kw * O, C), lambda n, t: (0, 0)),
                pl.BlockSpec((O, 1), lambda n, t: (0, 0)),
            ],
            out_specs=pl.BlockSpec((1, O, TL), lambda n, t: (n, 0, t)),
        ),
        compiler_params=pltpu.CompilerParams(
            dimension_semantics=("parallel", "parallel")),
    )(xflat, xflat, wmat, bias)

    # Padded-flat -> NCHW: reshape + slice only (no transpose needed).
    y = out[:, :, :F].reshape(N, O, Hp, Wp)[:, :, :H1, :W1]
    if stride > 1:
        # TODO(synk): stride>1 reuses the stride-1 result and subsamples
        # (numerically exact, but does stride^2 extra compute).
        y = y[:, :, ::stride, ::stride]
    return y


def _reference(x, w, gamma, beta, mean, var, stride, eps=1e-5):
    pad = (w.shape[2] - 1) // 2
    y = lax.conv_general_dilated(
        x.astype(jnp.float32), w.astype(jnp.float32),
        window_strides=(stride, stride),
        padding=[(pad, pad), (pad, pad)],
        dimension_numbers=("NCHW", "OIHW", "NCHW"))
    scale = gamma / jnp.sqrt(var + eps)
    bias = beta - mean * scale
    y = y * scale[None, :, None, None] + bias[None, :, None, None]
    return y * jax.nn.sigmoid(y)


if __name__ == "__main__":
    # BaseConv(in_channels=4, out_channels=8, kernel_size=3, stride=1, act='silu')
    # TODO(synk): only the 'silu' activation path is implemented (module default).
    in_channels, out_channels, ksize, stride = 4, 8, 3, 1
    N, H, W = 2, 16, 16

    key = jax.random.PRNGKey(0)
    kx, kw = jax.random.split(key)
    x = jax.random.normal(kx, (N, in_channels, H, W), dtype=jnp.float32)
    weight = 0.1 * jax.random.normal(
        kw, (out_channels, in_channels, ksize, ksize), dtype=jnp.float32)

    # Deterministic eval-mode BatchNorm running statistics / affine params.
    gamma = 1.0 + 0.1 * jnp.arange(out_channels, dtype=jnp.float32)
    beta = 0.05 * jnp.arange(out_channels, dtype=jnp.float32)
    running_mean = 0.01 * jnp.arange(out_channels, dtype=jnp.float32)
    running_var = jnp.ones((out_channels,), dtype=jnp.float32)

    y = base_conv_forward(x, weight, gamma, beta, running_mean, running_var,
                          stride=stride)
    y = jax.block_until_ready(y)

    y_ref = _reference(x, weight, gamma, beta, running_mean, running_var, stride)
    assert y.shape == (N, out_channels, H, W), y.shape
    # bf16 MXU operands -> relaxed tolerance vs the f32 reference.
    assert jnp.allclose(y, y_ref, atol=2e-2, rtol=2e-2), float(
        jnp.max(jnp.abs(y - y_ref)))

    print("KERNEL_OK")
</pallas_src>

<mosaic_0001>
module attributes {stable_mosaic.version = 11 : i64} {
  func.func @_conv_bn_silu_kernel(%arg0: i32, %arg1: i32, %arg2: memref<1x4x512xbf16, #tpu.memory_space<vmem>>, %arg3: memref<1x4x128xbf16, #tpu.memory_space<vmem>>, %arg4: memref<72x4xbf16, #tpu.memory_space<vmem>>, %arg5: memref<8x1xf32, #tpu.memory_space<vmem>>, %arg6: memref<1x8x512xf32, #tpu.memory_space<vmem>>) attributes {dimension_semantics = [#tpu.dimension_semantics<parallel>, #tpu.dimension_semantics<parallel>], iteration_bounds = array<i64: 2, 1>, scalar_prefetch = 0 : i64, scratch_operands = 0 : i64, tpu.core_type = #tpu.core_type<tc>, window_params = [{transform_indices = @transform_0, window_bounds = array<i64: 1, 4, 512>}, {transform_indices = @transform_1, window_bounds = array<i64: 1, 4, 128>}, {pipeline_mode = #tpu.pipeline_mode<synchronous>, transform_indices = @transform_2, window_bounds = array<i64: 72, 4>}, {pipeline_mode = #tpu.pipeline_mode<synchronous>, transform_indices = @transform_3, window_bounds = array<i64: 8, 1>}, {transform_indices = @transform_4, window_bounds = array<i64: 1, 8, 512>}]} {
    %c0 = arith.constant 0 : index
    %c0_0 = arith.constant 0 : index
    %c0_1 = arith.constant 0 : index
    %0 = vector.load %arg2[%c0, %c0_0, %c0_1] : memref<1x4x512xbf16, #tpu.memory_space<vmem>>, vector<1x4x512xbf16>
    %1 = vector.shape_cast %0 : vector<1x4x512xbf16> to vector<4x512xbf16>
    %c0_2 = arith.constant 0 : index
    %c0_3 = arith.constant 0 : index
    %c0_4 = arith.constant 0 : index
    %2 = vector.load %arg3[%c0_2, %c0_3, %c0_4] : memref<1x4x128xbf16, #tpu.memory_space<vmem>>, vector<1x4x128xbf16>
    %3 = vector.shape_cast %2 : vector<1x4x128xbf16> to vector<4x128xbf16>
    %4 = tpu.concatenate %1, %3 in 1 : vector<4x512xbf16>, vector<4x128xbf16> -> vector<4x640xbf16>
    %5 = vector.extract_strided_slice %4 {offsets = [0, 0], sizes = [4, 550], strides = [1, 1]} : vector<4x640xbf16> to vector<4x550xbf16>
    %c0_5 = arith.constant 0 : index
    %c0_6 = arith.constant 0 : index
    %6 = vector.load %arg4[%c0_5, %c0_6] : memref<72x4xbf16, #tpu.memory_space<vmem>>, vector<72x4xbf16>
    %cst = arith.constant dense<0.000000e+00> : vector<72x550xf32>
    %7 = tpu.matmul %6, %5, %cst {dimension_numbers = #tpu.dot_dimension_numbers<[1], [0], [0], [1], [0, 0, 1, 1], [], []>} : vector<72x4xbf16>, vector<4x550xbf16>, vector<72x550xf32> -> vector<72x550xf32>
    %cst_7 = arith.constant 0.000000e+00 : f32
    %8 = vector.broadcast %cst_7 : f32 to vector<8x512xf32>
    %9 = vector.extract_strided_slice %7 {offsets = [0, 0], sizes = [8, 512], strides = [1, 1]} : vector<72x550xf32> to vector<8x512xf32>
    %10 = arith.addf %8, %9 : vector<8x512xf32>
    %11 = vector.extract_strided_slice %7 {offsets = [8, 1], sizes = [8, 512], strides = [1, 1]} : vector<72x550xf32> to vector<8x512xf32>
    %12 = arith.addf %10, %11 : vector<8x512xf32>
    %13 = vector.extract_strided_slice %7 {offsets = [16, 2], sizes = [8, 512], strides = [1, 1]} : vector<72x550xf32> to vector<8x512xf32>
    %14 = arith.addf %12, %13 : vector<8x512xf32>
    %15 = vector.extract_strided_slice %7 {offsets = [24, 18], sizes = [8, 512], strides = [1, 1]} : vector<72x550xf32> to vector<8x512xf32>
    %16 = arith.addf %14, %15 : vector<8x512xf32>
    %17 = vector.extract_strided_slice %7 {offsets = [32, 19], sizes = [8, 512], strides = [1, 1]} : vector<72x550xf32> to vector<8x512xf32>
    %18 = arith.addf %16, %17 : vector<8x512xf32>
    %19 = vector.extract_strided_slice %7 {offsets = [40, 20], sizes = [8, 512], strides = [1, 1]} : vector<72x550xf32> to vector<8x512xf32>
    %20 = arith.addf %18, %19 : vector<8x512xf32>
    %21 = vector.extract_strided_slice %7 {offsets = [48, 36], sizes = [8, 512], strides = [1, 1]} : vector<72x550xf32> to vector<8x512xf32>
    %22 = arith.addf %20, %21 : vector<8x512xf32>
    %23 = vector.extract_strided_slice %7 {offsets = [56, 37], sizes = [8, 512], strides = [1, 1]} : vector<72x550xf32> to vector<8x512xf32>
    %24 = arith.addf %22, %23 : vector<8x512xf32>
    %25 = vector.extract_strided_slice %7 {offsets = [64, 38], sizes = [8, 512], strides = [1, 1]} : vector<72x550xf32> to vector<8x512xf32>
    %26 = arith.addf %24, %25 : vector<8x512xf32>
    %c0_8 = arith.constant 0 : index
    %c0_9 = arith.constant 0 : index
    %27 = vector.load %arg5[%c0_8, %c0_9] : memref<8x1xf32, #tpu.memory_space<vmem>>, vector<8x1xf32>
    %28 = vector.broadcast %27 : vector<8x1xf32> to vector<8x512xf32>
    %29 = arith.addf %26, %28 : vector<8x512xf32>
    %cst_10 = arith.constant 0.000000e+00 : f32
    %30 = vector.broadcast %cst_10 : f32 to vector<8x512xf32>
    %31 = arith.subf %30, %29 : vector<8x512xf32>
    %32 = math.exp %31 : vector<8x512xf32>
    %cst_11 = arith.constant 1.000000e+00 : f32
    %33 = vector.broadcast %cst_11 : f32 to vector<8x512xf32>
    %34 = arith.addf %33, %32 : vector<8x512xf32>
    %35 = tpu.reciprocal %34 {approx = true} : vector<8x512xf32> -> vector<8x512xf32>
    %36 = arith.mulf %29, %35 : vector<8x512xf32>
    %c0_12 = arith.constant 0 : index
    %c0_13 = arith.constant 0 : index
    %c0_14 = arith.constant 0 : index
    %37 = vector.load %arg6[%c0_12, %c0_13, %c0_14] : memref<1x8x512xf32, #tpu.memory_space<vmem>>, vector<1x8x512xf32>
    %38 = vector.shape_cast %37 : vector<1x8x512xf32> to vector<8x512xf32>
    %39 = vector.shape_cast %36 : vector<8x512xf32> to vector<1x8x512xf32>
    tpu.vector_store %arg6[%c0_12, %c0_13, %c0_14], %39 {strides = array<i32>} : memref<1x8x512xf32, #tpu.memory_space<vmem>>, vector<1x8x512xf32>,
    return
  }
  func.func @transform_0(%arg0: i32, %arg1: i32) -> (i32, i32, i32) {
    %c0_i32 = arith.constant 0 : i32
    %c0_i32_0 = arith.constant 0 : i32
    return %arg0, %c0_i32, %arg1 : i32, i32, i32
  }
  func.func @transform_1(%arg0: i32, %arg1: i32) -> (i32, i32, i32) {
    %c1_i32 = arith.constant 1 : i32
    %0 = arith.addi %arg1, %c1_i32 : i32
    %c4_i32 = arith.constant 4 : i32
    %1 = arith.muli %0, %c4_i32 : i32
    %c0_i32 = arith.constant 0 : i32
    %c0_i32_0 = arith.constant 0 : i32
    return %arg0, %c0_i32, %1 : i32, i32, i32
  }
  func.func @transform_2(%arg0: i32, %arg1: i32) -> (i32, i32) {
    %c0_i32 = arith.constant 0 : i32
    %c0_i32_0 = arith.constant 0 : i32
    %c0_i32_1 = arith.constant 0 : i32
    return %c0_i32, %c0_i32_0 : i32, i32
  }
  func.func @transform_3(%arg0: i32, %arg1: i32) -> (i32, i32) {
    %c0_i32 = arith.constant 0 : i32
    %c0_i32_0 = arith.constant 0 : i32
    %c0_i32_1 = arith.constant 0 : i32
    return %c0_i32, %c0_i32_0 : i32, i32
  }
  func.func @transform_4(%arg0: i32, %arg1: i32) -> (i32, i32, i32) {
    %c0_i32 = arith.constant 0 : i32
    %c0_i32_0 = arith.constant 0 : i32
    return %arg0, %c0_i32, %arg1 : i32, i32, i32
  }
}

</mosaic_0001>

<bundles_post_ra>
// kernel: base_conv_forward.1
= control target key start
LH: loop header
LB: loop body
LE: loop exit
PB: predicated region body
PF: predicated region fallthrough
CT: control target
= control target key end

     0   :  { %s1180_s15 = smov 0   ;;  %s1182_s16 = smov 0   ;;  %s1383_s0 = inlined_call_operand.vmem [shape: bf16[2,4,640], index: 0, kind: input, shape index: {}, may-alias: {0,1}]   ;;  %s1384_s1 = inlined_call_operand.vmem [shape: bf16[2,4,640], index: 1, kind: input, shape index: {}, may-alias: {0,1}]   ;;  %s1385_s2 = inlined_call_operand.vmem [shape: bf16[72,4], index: 2, kind: input, shape index: {}]   ;;  %s1386_s3 = inlined_call_operand.vmem [shape: f32[8,1], index: 3, kind: input, shape index: {}]   ;;  %s1387_s4 = inlined_call_operand.vmem [shape: f32[2,8,512], index: 4, kind: output, shape index: {}]  }
   0x1   :  { %s1184_s17 = smov 0  }
   0x2 LB: > { %s26_s18 = sadd.s32 1, %s1137_s16  ;;  %p995_p0 = scmp.ge.s32.totalorder %s1141_s17, 1  ;;  %s1141_s17 = sphi %s1184_s17, %s14_s17   ;;  %s1137_s16 = sphi %s1182_s16, %s1389_s16   ;;  %s1133_s15 = sphi %s1180_s15, %s1388_s15  }
   0x3   : > { %p28_p1 = scmp.ge.s32.totalorder %s26_s18, 2  ;;  %p214_p2 = scmp.lt.s32.totalorder %s1141_s17, 3 }
   0x5   : > { %s1391_s18 = smov (%p28_p1, %s26_s18), 0  ;;  %p215_p3 = pnand %p995_p0, %p214_p2 }
   0x6   : > { %p267_p4 = scmp.lt.s32.totalorder (!%p215_p3), %s1133_s15, 1  ;;  %v310_v0 = vlaneseq (!%p215_p3)  ;;  %v1143_v1 = vmov (!%p215_p3), 1983009808   ;;  %v1144_v3 = vmov (!%p215_p3), 0   ;;  %v848_v7 = vld [vmem:[%s1386_s3] sm:$0xff] (!%p215_p3)  ;;  %vm371_vm0 = vcmask (!%p215_p3), 1041408  }
   0x7   : > { %218 = sbr.rel (%p215_p3) target bundleno = 470 (0x1d6), region = 36  ;;  %v308_v2 = vunpack.c.l.s4 (!%p215_p3), %v1143_v1  ;;  %449 = vmatprep.mubr.bf16.mxu1 (!%p215_p3), %v1144_v3  ;;  %419 = vmatprep.mubr.bf16.mxu0 (!%p215_p3), %v1144_v3  ;;  %v1098_v14 = vld [vmem:[%s1385_s2 + $0x18] sm:$0xff] (!%p215_p3)   ;;  %v1099_v15 = vld [vmem:[%s1385_s2] sm:$0xff] (!%p215_p3)   ;;  %vm355_vm1 = vcmask (!%p215_p3), 31744   ;;  %v1145_v19 = vmov (!%p215_p3), 0.0   ;;  %v1100_v21 = vld [vmem:[%s1385_s2 + $0x8] sm:$0xff] (!%p215_p3)  }
   0x8   : > { %v311_v4 = vshrl.u32 (!%p215_p3), %v310_v0, 7  ;;  %1096 = vset.pattern.permute.xlu0 (!%p215_p3), %v1144_v3  ;;  %v1101_v22 = vld [vmem:[%s1385_s2 + $0x20] ss:$0 sps:$4 sm:$0xff] (!%p215_p3)   ;;  %v1102_v23 = vld [vmem:[%s1385_s2 + $0x10] sm:$0xff] (!%p215_p3)   ;;  %vm1146_vm2 = vmmov (!%p215_p3), 0   ;;  %s1147_s13 = smov (!%p215_p3), 92  }
   0x9   : > { %v309_v5 = vunpack.c.0.s8 (!%p215_p3), %v308_v2  ;;  %851 = vperm.xlu0 (!%p215_p3), %1096, %v848_v7   ;;  %s1148_s14 = smov (!%p215_p3), 91   ;;  %s1150_s20 = smov (!%p215_p3), 126   ;;  %vm639_vm3 = vcmask (!%p215_p3), 1039360   ;;  %vm667_vm4 = vcmask (!%p215_p3), 1031168   ;;  %vm695_vm5 = vcmask (!%p215_p3), 900096  }
   0xa   : > { %s1151_s21 = smov (!%p215_p3), 90   ;;  %s1154_s24 = smov (!%p215_p3), 108   ;;  %vm723_vm6 = vcmask (!%p215_p3), 891904   ;;  %vm751_vm7 = vcmask (!%p215_p3), 883712   ;;  %vm779_vm8 = vcmask (!%p215_p3), 752640   ;;  %vm807_vm9 = vcmask (!%p215_p3), 744448  }
   0xb   : > { %v312_v6 = vsub.s32 (!%p215_p3), %v309_v5, %v311_v4  ;;  %vm835_vm10 = vcmask (!%p215_p3), 736256  }
   0xe   : > { %s1393_s15 = smov (!%p267_p4, %s1133_s15), 1 }
   0xf   : > { %s1057_s19 = smul.u32 10, %s1393_s15  ;;  %s1026_s25 = sshll.u32 %s1393_s15, 5 }
  0x11   : > { %s274_s22 = scalar_lea.vmem %s1383_s0, %s1057_s19  ;;  %s1025_s23 = sadd.s32 8, %s1057_s19 }
  0x12   : > { %v303_v8 = vld [vmem:[%s274_s22] sm:$0xff]  ;;  %s289_s28 = scalar_lea.vmem %s1384_s1, %s1025_s23  ;;  %s1149_s19 = smov 127  }
  0x13   : > { %v306_v9 = vcombine.high %v303_v8, %v303_v8  ;;  %v313_v10 = vrot.slane %v303_v8, %v312_v6  ;;  %v304_v17 = vld [vmem:[%s289_s28] sm:$0x3]  ;;  %s1152_s22 = smov 110   ;;  %s1153_s23 = smov 109  }
  0x14   : > { %v385_v20 = vsel %vm371_vm0, %v304_v17, 0  ;;  %s1360_s28 = scalar_lea.vmem %s1387_s4, %s1026_s25 }
  0x15   : > { %v320_v11 = vrot.slane %v306_v9, %v312_v6  ;;  %v321_v12 = vcombine.high %v313_v10, %v313_v10  ;;  %v373_v13 = vsel %vm371_vm0, %v313_v10, 0 }
  0x17   : > { %1055 = vmatprep.subr.msk.bf16.mxu1 %vm371_vm0, %v321_v12  ;;  %1005 = vmatprep.subr.msk.bf16.mxu0 %vm371_vm0, %v321_v12  ;;  %v322_v16 = vcombine.high %v320_v11, %v320_v11  ;;  %v379_v18 = vsel %vm371_vm0, %v320_v11, 0 }
  0x18   : > { %1056 = vmatpush1.bf16.msra.mxu1 %v373_v13  ;;  %388 = vmatpush1.bf16.msra.mxu0 %v373_v13 }
  0x19   : > { %1011 = vmatprep.subr.msk.bf16.mxu1 %vm371_vm0, %v322_v16  ;;  %1033 = vmatprep.subr.bf16.mxu0 %v1145_v19 }
  0x1b   : > { %1009 = vmatmul.mubr.msk.bf16.vlgmr.msra.gmra.mrb[0].mxu1 %vm355_vm1, %v1098_v14  ;;  %1006 = vmatmul.mubr.msk.bf16.vlgmr.msra.gmra.mrb[0].mxu0 %vm355_vm1, %v1099_v15 }
  0x1c   : > { %429 = vmatprep.mubr.bf16.mxu0 %v1144_v3  ;;  %469 = vmatpush1.bf16.msra.mxu1 %v379_v18 }
  0x1d   : > { %459 = vmatprep.mubr.bf16.mxu1 %v1144_v3  ;;  %1034 = vmatpush3.bf16.msra.mxu0 %v385_v20 }
  0x23   : > { %1007 = vmatmul.mubr.msk.bf16.gmra.mrb[4].mxu0 %vm355_vm1, %v1100_v21  ;;  %1010 = vmatmul.mubr.msk.bf16.gmra.mrb[4].mxu1 %vm355_vm1, %v1101_v22 }
  0x24   : > { %439 = vmatprep.mubr.bf16.mxu0 %v1144_v3  ;;  %500 = vmatprep.mubr.bf16.mxu1 %v1144_v3 }
  0x2b   : > { %1008 = vmatmul.mubr.msk.bf16.gmra.mrb[8].mxu0 %vm355_vm1, %v1102_v23  ;;  %1012 = vmatmul.mubr.msk.bf16.vlgmr.msra.gmra.mrb[8].mxu1 %vm355_vm1, %v1099_v15 }
  0x2c   : > { %510 = vmatprep.mubr.bf16.mxu1 %v1144_v3  ;;  %1035 = vmatprep.mubr.msk.bf16.mxu0 %vm1146_vm2, %v1145_v19 }
  0x33   : > { %1013 = vmatmul.mubr.msk.bf16.gmra.mrb[12].mxu1 %vm355_vm1, %v1100_v21  ;;  %1036 = vmatmul.mubr.msk.bf16.vlgmr.msra.gmra.mrb[12].mxu0 %vm355_vm1, %v1099_v15 }
  0x34   : > { %520 = vmatprep.mubr.bf16.mxu1 %v1144_v3  ;;  %1039 = vmatprep.mubr.msk.bf16.mxu0 %vm1146_vm2, %v1145_v19 }
  0x3b   : > { %1014 = vmatmul.mubr.msk.bf16.gmra.mrb[16].mxu1 %vm355_vm1, %v1102_v23  ;;  %1040 = vmatmul.mubr.msk.bf16.gmra.mrb[16].mxu0 %vm355_vm1, %v1100_v21 }
  0x3c   : > { %530 = vmatprep.mubr.bf16.mxu1 %v1144_v3  ;;  %1043 = vmatprep.mubr.msk.bf16.mxu0 %vm1146_vm2, %v1145_v19 }
  0x43   : > { %1015 = vmatmul.mubr.msk.bf16.gmra.mrb[20].mxu1 %vm355_vm1, %v1098_v14  ;;  %1044 = vmatmul.mubr.msk.bf16.gmra.mrb[20].mxu0 %vm355_vm1, %v1102_v23 }
  0x44   : > { %1047 = vmatprep.mubr.msk.bf16.mxu0 %vm1146_vm2, %v1145_v19  ;;  %540 = vmatprep.mubr.bf16.mxu1 %v1144_v3 }
  0x4b   : > { %1048 = vmatmul.mubr.msk.bf16.gmra.mrb[24].mxu0 %vm355_vm1, %v1098_v14  ;;  %1016 = vmatmul.mubr.msk.bf16.gmra.mrb[24].mxu1 %vm355_vm1, %v1101_v22 }
  0x4c   : > { %1051 = vmatprep.mubr.msk.bf16.mxu0 %vm1146_vm2, %v1145_v19 }
  0x53   : > { %1052 = vmatmul.mubr.msk.bf16.gmra.mrb[28].mxu0 %vm355_vm1, %v1101_v22 }
  0x88   : > { %v1310_v20 = vpop.permute.xlu0 %851 }
  0xee   : > { %v451_v24 = vpop.f32.mrb[0].mxu1  ;;  %v1262_v25 = vpop.f32.mrb[0].mxu0 }
  0xef   : > { %769 = vrot.lane.b32.xlu1 %v451_v24, %s1147_s13  ;;  %v453_v26 = vpop.f32.mrb[1].mxu1  ;;  %v1265_v27 = vpop.f32.mrb[1].mxu0 }
  0xf0   : > { %771 = vrot.lane.b32.xlu0 %v453_v26, %s1147_s13  ;;  %v455_v28 = vpop.f32.mrb[2].mxu1  ;;  %v425_v29 = vpop.f32.mrb[2].mxu0 }
  0xf1   : > { %v457_v30 = vpop.f32.mrb[3].mxu1  ;;  %v427_v31 = vpop.f32.mrb[3].mxu0 }
  0xf3   : > { %797 = vrot.lane.b32.xlu1 %v455_v28, %s1148_s14 }
  0xf4   : > { %629 = vrot.lane.b32.xlu0 %v425_v29, %s1149_s19 }
  0xf6   : > { %v431_v32 = vpop.f32.mrb[4].mxu0  ;;  %v461_v33 = vpop.f32.mrb[4].mxu1 }
  0xf7   : > { %799 = vrot.lane.b32.xlu1 %v457_v30, %s1148_s14  ;;  %v433_v34 = vpop.f32.mrb[5].mxu0  ;;  %v463_v35 = vpop.f32.mrb[5].mxu1 }
  0xf8   : > { %631 = vrot.lane.b32.xlu0 %v427_v31, %s1149_s19  ;;  %v435_v36 = vpop.f32.mrb[6].mxu0  ;;  %v465_v37 = vpop.f32.mrb[6].mxu1 }
  0xf9   : > { %v437_v38 = vpop.f32.mrb[7].mxu0  ;;  %v466_v39 = vpop.f32.mrb[7].mxu1 }
  0xfb   : > { %657 = vrot.lane.b32.xlu1 %v431_v32, %s1150_s20 }
  0xfc   : > { %659 = vrot.lane.b32.xlu0 %v433_v34, %s1150_s20 }
  0xfe   : > { %v441_v40 = vpop.f32.mrb[8].mxu0  ;;  %v1274_v41 = vpop.f32.mrb[8].mxu1 }
  0xff   : > { %825 = vrot.lane.b32.xlu1 %v461_v33, %s1151_s21  ;;  %v443_v42 = vpop.f32.mrb[9].mxu0  ;;  %v1277_v43 = vpop.f32.mrb[9].mxu1 }
 0x100   : > { %827 = vrot.lane.b32.xlu0 %v463_v35, %s1151_s21  ;;  %v445_v44 = vpop.f32.mrb[10].mxu0  ;;  %v506_v45 = vpop.f32.mrb[10].mxu1 }
 0x101   : > { %v447_v46 = vpop.f32.mrb[11].mxu0  ;;  %v508_v47 = vpop.f32.mrb[11].mxu1 }
 0x103   : > { %687 = vrot.lane.b32.xlu1 %v437_v38, %s1152_s22 }
 0x104   : > { %685 = vrot.lane.b32.xlu0 %v435_v36, %s1152_s22 }
 0x106   : > { %v512_v48 = vpop.f32.mrb[12].mxu1  ;;  %v583_v49 = vpop.f32.mrb[12].mxu0 }
 0x107   : > { %713 = vrot.lane.b32.xlu1 %v441_v40, %s1153_s23  ;;  %v514_v50 = vpop.f32.mrb[13].mxu1  ;;  %v1037_v51 = vpop.f32.mrb[13].mxu0 }
 0x108   : > { %715 = vrot.lane.b32.xlu0 %v443_v42, %s1153_s23  ;;  %v585_v52 = vpop.f32.mrb[14].mxu0  ;;  %v516_v53 = vpop.f32.mrb[14].mxu1 }
 0x109   : > { %v518_v54 = vpop.f32.mrb[15].mxu1  ;;  %v1038_v55 = vpop.f32.mrb[15].mxu0 }
 0x10b   : > { %633 = vrot.lane.b32.xlu1 %v506_v45, %s1149_s19 }
 0x10c   : > { %741 = vrot.lane.b32.xlu0 %v445_v44, %s1154_s24 }
 0x10e   : > { %v522_v56 = vpop.f32.mrb[16].mxu1  ;;  %v590_v57 = vpop.f32.mrb[16].mxu0 }
 0x10f   : > { %635 = vrot.lane.b32.xlu1 %v508_v47, %s1149_s19  ;;  %v524_v58 = vpop.f32.mrb[17].mxu1  ;;  %v1041_v59 = vpop.f32.mrb[17].mxu0 }
 0x110   : > { %663 = vrot.lane.b32.xlu0 %v514_v50, %s1150_s20  ;;  %v593_v60 = vpop.f32.mrb[18].mxu0  ;;  %v526_v61 = vpop.f32.mrb[18].mxu1 }
 0x111   : > { %v1042_v62 = vpop.f32.mrb[19].mxu0  ;;  %v528_v63 = vpop.f32.mrb[19].mxu1 }
 0x113   : > { %743 = vrot.lane.b32.xlu1 %v447_v46, %s1154_s24 }
 0x114   : > { %637 = vrot.lane.b32.xlu0 %v585_v52, %s1149_s19 }
 0x116   : > { %v532_v0 = vpop.f32.mrb[20].mxu1  ;;  %v598_v1 = vpop.f32.mrb[20].mxu0 }
 0x117   : > { %661 = vrot.lane.b32.xlu1 %v512_v48, %s1150_s20  ;;  %v534_v2 = vpop.f32.mrb[21].mxu1  ;;  %v1045_v3 = vpop.f32.mrb[21].mxu0 }
 0x118   : > { %689 = vrot.lane.b32.xlu0 %v516_v53, %s1152_s22  ;;  %v601_v4 = vpop.f32.mrb[22].mxu0  ;;  %v536_v5 = vpop.f32.mrb[22].mxu1 }
 0x119   : > { %v1046_v6 = vpop.f32.mrb[23].mxu0  ;;  %v538_v7 = vpop.f32.mrb[23].mxu1 }
 0x11b   : > { %691 = vrot.lane.b32.xlu1 %v518_v54, %s1152_s22 }
 0x11c   : > { %719 = vrot.lane.b32.xlu0 %v524_v58, %s1153_s23 }
 0x11e   : > { %v606_v8 = vpop.f32.mrb[24].mxu0  ;;  %v542_v9 = vpop.f32.mrb[24].mxu1 }
 0x11f   : > { %665 = vrot.lane.b32.xlu1 %v590_v57, %s1150_s20  ;;  %v1049_v10 = vpop.f32.mrb[25].mxu0  ;;  %v544_v11 = vpop.f32.mrb[25].mxu1 }
 0x120   : > { %693 = vrot.lane.b32.xlu0 %v593_v60, %s1152_s22  ;;  %v609_v12 = vpop.f32.mrb[26].mxu0  ;;  %v546_v13 = vpop.f32.mrb[26].mxu1 }
 0x121   : > { %v1050_v14 = vpop.f32.mrb[27].mxu0  ;;  %v547_v15 = vpop.f32.mrb[27].mxu1 }
 0x123   : > { %717 = vrot.lane.b32.xlu1 %v522_v56, %s1153_s23 }
 0x124   : > { %745 = vrot.lane.b32.xlu0 %v526_v61, %s1154_s24 }
 0x126   : > { %v614_v16 = vpop.f32.mrb[28].mxu0 }
 0x127   : > { %747 = vrot.lane.b32.xlu1 %v528_v63, %s1154_s24  ;;  %v1053_v17 = vpop.f32.mrb[29].mxu0 }
 0x128   : > { %775 = vrot.lane.b32.xlu0 %v534_v2, %s1147_s13  ;;  %v617_v18 = vpop.f32.mrb[30].mxu0 }
 0x129   : > { %v1054_v19 = vpop.f32.mrb[31].mxu0 }
 0x12b   : > { %721 = vrot.lane.b32.xlu1 %v598_v1, %s1153_s23 }
 0x12c   : > { %749 = vrot.lane.b32.xlu0 %v601_v4, %s1154_s24 }
 0x12f   : > { %773 = vrot.lane.b32.xlu1 %v532_v0, %s1147_s13 }
 0x130   : > { %801 = vrot.lane.b32.xlu0 %v536_v5, %s1148_s14 }
 0x133   : > { %803 = vrot.lane.b32.xlu1 %v538_v7, %s1148_s14 }
 0x134   : > { %805 = vrot.lane.b32.xlu0 %v609_v12, %s1148_s14 }
 0x137   : > { %777 = vrot.lane.b32.xlu1 %v606_v8, %s1147_s13 }
 0x138   : > { %831 = vrot.lane.b32.xlu0 %v544_v11, %s1151_s21 }
 0x13b   : > { %829 = vrot.lane.b32.xlu1 %v542_v9, %s1151_s21 }
 0x13f   : > { %833 = vrot.lane.b32.xlu1 %v614_v16, %s1151_s21 }
 0x161   : > { %v770_v21 = vpop.permute.xlu1 %769 }
 0x162   : > { %v1312_v22 = vpop.permute.xlu0 %771 }
 0x165   : > { %v798_v23 = vpop.permute.xlu1 %797 }
 0x166   : > { %v630_v24 = vpop.permute.xlu0 %629 }
 0x169   : > { %v1314_v26 = vpop.permute.xlu1 %799 }
 0x16a   : > { %v632_v28 = vpop.permute.xlu0 %631  ;;  %v808_v57 = vsel %vm807_vm9, %v798_v23, %v1314_v26 }
 0x16b   : > { %v640_v37 = vsel %vm639_vm3, %v630_v24, %v632_v28 }
 0x16c   : > { %v648_v42 = vadd.f32 %v640_v37, %v1262_v25  ;;  %v780_v25 = vsel %vm779_vm8, %v770_v21, %v1312_v22 }
 0x16d   : > { %v658_v29 = vpop.permute.xlu1 %657 }
 0x16e   : > { %v660_v30 = vpop.permute.xlu0 %659 }
 0x16f   : > { %v668_v39 = vsel %vm667_vm4, %v658_v29, %v660_v30 }
 0x170   : > { %v676_v45 = vadd.f32 %v668_v39, %v648_v42 }
 0x171   : > { %v826_v31 = vpop.permute.xlu1 %825 }
 0x172   : > { %v1316_v32 = vpop.permute.xlu0 %827 }
 0x173   : > { %v836_v60 = vsel %vm835_vm10, %v826_v31, %v1316_v32 }
 0x175   : > { %v688_v33 = vpop.permute.xlu1 %687 }
 0x176   : > { %v686_v34 = vpop.permute.xlu0 %685 }
 0x177   : > { %v696_v44 = vsel %vm695_vm5, %v686_v34, %v688_v33 }
 0x178   : > { %v704_v49 = vadd.f32 %v696_v44, %v676_v45 }
 0x179   : > { %v714_v35 = vpop.permute.xlu1 %713 }
 0x17a   : > { %v716_v36 = vpop.permute.xlu0 %715 }
 0x17b   : > { %v724_v47 = vsel %vm723_vm6, %v714_v35, %v716_v36 }
 0x17c   : > { %v732_v50 = vadd.f32 %v724_v47, %v704_v49 }
 0x17d   : > { %v634_v38 = vpop.permute.xlu1 %633 }
 0x17e   : > { %v742_v40 = vpop.permute.xlu0 %741  ;;  %v641_v3 = vsel %vm639_vm3, %v632_v28, %v634_v38 }
 0x17f   : > { %v649_v7 = vadd.f32 %v641_v3, %v1265_v27 }
 0x181   : > { %v636_v46 = vpop.permute.xlu1 %635 }
 0x182   : > { %v664_v48 = vpop.permute.xlu0 %663  ;;  %v642_v19 = vsel %vm639_vm3, %v634_v38, %v636_v46 }
 0x183   : > { %v650_v31 = vadd.f32 %v642_v19, %v1274_v41 }
 0x185   : > { %v744_v51 = vpop.permute.xlu1 %743 }
 0x186   : > { %v752_v52 = vsel %vm751_vm7, %v742_v40, %v744_v51  ;;  %v638_v53 = vpop.permute.xlu0 %637 }
 0x187   : > { %v760_v54 = vadd.f32 %v752_v52, %v732_v50  ;;  %v643_v16 = vsel %vm639_vm3, %v636_v46, %v638_v53 }
 0x188   : > { %v651_v28 = vadd.f32 %v643_v16, %v1277_v43 }
 0x189   : > { %v788_v55 = vadd.f32 %v780_v25, %v760_v54  ;;  %v662_v56 = vpop.permute.xlu1 %661 }
 0x18a   : > { %v690_v58 = vpop.permute.xlu0 %689  ;;  %v669_v6 = vsel %vm667_vm4, %v660_v30, %v662_v56  ;;  %v670_v30 = vsel %vm667_vm4, %v662_v56, %v664_v48 }
 0x18b   : > { %v816_v59 = vadd.f32 %v808_v57, %v788_v55  ;;  %v677_v10 = vadd.f32 %v669_v6, %v649_v7  ;;  %v697_v11 = vsel %vm695_vm5, %v688_v33, %v690_v58  ;;  %v678_v40 = vadd.f32 %v670_v30, %v650_v31 }
 0x18d   : > { %v844_v61 = vadd.f32 %v836_v60, %v816_v59  ;;  %v692_v62 = vpop.permute.xlu1 %691  ;;  %v705_v15 = vadd.f32 %v697_v11, %v677_v10 }
 0x18e   : > { %v720_v63 = vpop.permute.xlu0 %719 }
 0x18f   : > { %v854_v0 = vadd.f32 %v1310_v20, %v844_v61 }
 0x191   : > { %v858_v1 = vsub.f32 0.0, %v854_v0  ;;  %v666_v2 = vpop.permute.xlu1 %665 }
 0x192   : > { %v694_v4 = vpop.permute.xlu0 %693  ;;  %v671_v21 = vsel %vm667_vm4, %v664_v48, %v666_v2 }
 0x193   : > { %v862_v5 = vmul.f32 1.442695, %v858_v1  ;;  %v679_v33 = vadd.f32 %v671_v21, %v651_v28  ;;  %v699_v37 = vsel %vm695_vm5, %v692_v62, %v694_v4 }
 0x195   : > { %1103 = vpow2.f32 %v862_v5  ;;  %v718_v8 = vpop.permute.xlu1 %717  ;;  %v707_v46 = vadd.f32 %v699_v37, %v679_v33 }
 0x196   : > { %v746_v9 = vpop.permute.xlu0 %745  ;;  %v725_v13 = vsel %vm723_vm6, %v716_v36, %v718_v8  ;;  %v698_v36 = vsel %vm695_vm5, %v690_v58, %v692_v62  ;;  %v726_v41 = vsel %vm723_vm6, %v718_v8, %v720_v63 }
 0x197   : > { %v733_v17 = vadd.f32 %v725_v13, %v705_v15  ;;  %v753_v27 = vsel %vm751_vm7, %v744_v51, %v746_v9  ;;  %v706_v45 = vadd.f32 %v698_v36, %v678_v40 }
 0x199   : > { %v748_v12 = vpop.permute.xlu1 %747  ;;  %v761_v34 = vadd.f32 %v753_v27, %v733_v17  ;;  %v734_v50 = vadd.f32 %v726_v41, %v706_v45 }
 0x19a   : > { %v776_v14 = vpop.permute.xlu0 %775  ;;  %v754_v49 = vsel %vm751_vm7, %v746_v9, %v748_v12 }
 0x19b   : > { %v762_v54 = vadd.f32 %v754_v49, %v734_v50 }
 0x19d   : > { %v722_v18 = vpop.permute.xlu1 %721 }
 0x19e   : > { %v750_v23 = vpop.permute.xlu0 %749  ;;  %v727_v44 = vsel %vm723_vm6, %v720_v63, %v722_v18 }
 0x19f   : > { %v1104_v24 = vpop.eup %1103  ;;  %v735_v51 = vadd.f32 %v727_v44, %v707_v46  ;;  %v755_v52 = vsel %vm751_vm7, %v748_v12, %v750_v23 }
 0x1a0   : > { %v870_v29 = vadd.f32 1.0, %v1104_v24 }
 0x1a1   : > { %v774_v35 = vpop.permute.xlu1 %773  ;;  %v763_v56 = vadd.f32 %v755_v52, %v735_v51 }
 0x1a2   : > { %1105 = vrcp.f32 %v870_v29  ;;  %v781_v38 = vsel %vm779_vm8, %v1312_v22, %v774_v35  ;;  %v802_v39 = vpop.permute.xlu0 %801  ;;  %v782_v53 = vsel %vm779_vm8, %v774_v35, %v776_v14 }
 0x1a3   : > { %v789_v42 = vadd.f32 %v781_v38, %v761_v34  ;;  %v809_v43 = vsel %vm807_vm9, %v1314_v26, %v802_v39  ;;  %v790_v57 = vadd.f32 %v782_v53, %v762_v54 }
 0x1a5   : > { %v817_v47 = vadd.f32 %v809_v43, %v789_v42  ;;  %v804_v48 = vpop.permute.xlu1 %803 }
 0x1a6   : > { %v806_v22 = vpop.permute.xlu0 %805  ;;  %v810_v26 = vsel %vm807_vm9, %v802_v39, %v804_v48 }
 0x1a7   : > { %v818_v61 = vadd.f32 %v810_v26, %v790_v57  ;;  %v811_v5 = vsel %vm807_vm9, %v804_v48, %v806_v22 }
 0x1a9   : > { %v778_v25 = vpop.permute.xlu1 %777 }
 0x1aa   : > { %v783_v55 = vsel %vm779_vm8, %v776_v14, %v778_v25  ;;  %v832_v58 = vpop.permute.xlu0 %831 }
 0x1ab   : > { %v791_v62 = vadd.f32 %v783_v55, %v763_v56 }
 0x1ac   : > { %v1106_v59 = vpop.eup %1105 }
 0x1ad   : > { %v878_v60 = vmul.f32 %v1106_v59, %v854_v0  ;;  %v830_v63 = vpop.permute.xlu1 %829  ;;  %v819_v8 = vadd.f32 %v811_v5, %v791_v62 }
 0x1ae   : > { %v837_v1 = vsel %vm835_vm10, %v1316_v32, %v830_v63  ;;  %v838_v2 = vsel %vm835_vm10, %v830_v63, %v832_v58 }
 0x1af   : > { %882 = vst [vmem:[%s1360_s28] sm:$0xff] %v878_v60  ;;  %v845_v3 = vadd.f32 %v837_v1, %v817_v47  ;;  %v846_v4 = vadd.f32 %v838_v2, %v818_v61 }
 0x1b1   : > { %v855_v6 = vadd.f32 %v1310_v20, %v845_v3  ;;  %v856_v7 = vadd.f32 %v1310_v20, %v846_v4  ;;  %v834_v9 = vpop.permute.xlu1 %833 }
 0x1b2   : > { %v839_v0 = vsel %vm835_vm10, %v832_v58, %v834_v9 }
 0x1b3   : > { %v859_v10 = vsub.f32 0.0, %v855_v6  ;;  %v860_v11 = vsub.f32 0.0, %v856_v7  ;;  %v847_v12 = vadd.f32 %v839_v0, %v819_v8 }
 0x1b5   : > { %v864_v13 = vmul.f32 1.442695, %v859_v10  ;;  %v866_v32 = vmul.f32 1.442695, %v860_v11  ;;  %v857_v14 = vadd.f32 %v1310_v20, %v847_v12 }
 0x1b7   : > { %1107 = vpow2.f32 %v864_v13  ;;  %v861_v15 = vsub.f32 0.0, %v857_v14 }
 0x1b8   : > { %1109 = vpow2.f32 %v866_v32 }
 0x1b9   : > { %v868_v16 = vmul.f32 1.442695, %v861_v15 }
 0x1bb   : > { %1111 = vpow2.f32 %v868_v16 }
 0x1c1   : > { %v1108_v17 = vpop.eup %1107 }
 0x1c2   : > { %v1110_v18 = vpop.eup %1109  ;;  %v871_v19 = vadd.f32 1.0, %v1108_v17 }
 0x1c3   : > { %v872_v21 = vadd.f32 1.0, %v1110_v18 }
 0x1c4   : > { %1113 = vrcp.f32 %v871_v19 }
 0x1c5   : > { %v1112_v27 = vpop.eup %1111  ;;  %1115 = vrcp.f32 %v872_v21 }
 0x1c6   : > { %v873_v23 = vadd.f32 1.0, %v1112_v27 }
 0x1c8   : > { %1117 = vrcp.f32 %v873_v23 }
 0x1ce   : > { %v1114_v24 = vpop.eup %1113 }
 0x1cf   : > { %v1116_v28 = vpop.eup %1115  ;;  %v879_v20 = vmul.f32 %v1114_v24, %v855_v6 }
 0x1d0   : > { %v880_v29 = vmul.f32 %v1116_v28, %v856_v7 }
 0x1d1   : > { %883 = vst [vmem:[%s1360_s28 + $0x8] sm:$0xff] %v879_v20 }
 0x1d2   : > { %v1118_v30 = vpop.eup %1117  ;;  %884 = vst [vmem:[%s1360_s28 + $0x10] sm:$0xff] %v880_v29 }
 0x1d3   : > { %v881_v31 = vmul.f32 %v1118_v30, %v857_v14 }
 0x1d5   : > { %885 = vst [vmem:[%s1360_s28 + $0x18] sm:$0xff] %v881_v31 }
 0x1d6 PF: > { %s14_s17 = sadd.s32 1, %s1141_s17   ;;  %s1388_s15 = smov %s1137_s16 }
 0x1d7   : > { %p11_p5 = scmp.ge.s32.totalorder %s14_s17, 4   ;;  %s1389_s16 = smov %s1391_s18 }
 0x1d9   :  { %13 = sbr.rel (!%p11_p5) target bundleno = 2 (0x2), region = 69 }

</bundles_post_ra>
